<compile_context>
chip_gen: v6e
topology: v6e:2x2x1
jax: 0.10.0
libtpu: 0.0.40
codegen_flags: <defaults>
</compile_context>

<pallas_src>
import functools

import jax
import jax.numpy as jnp
from jax.experimental import pallas as pl
from jax.experimental.pallas import tpu as pltpu


# ---------------------------------------------------------------------------
# Kernels
# ---------------------------------------------------------------------------
def _mm_kernel_resident_w(x_ref, w_ref, o_ref, *, precision):
    """Fast path: W is resident in VMEM (constant index_map -> DMA'd once);
    full K reduction in a single dot per M tile."""
    o_ref[...] = jnp.dot(
        x_ref[...], w_ref[...],
        preferred_element_type=jnp.float32, precision=precision,
    ).astype(o_ref.dtype)


def _mm_kernel_tiled_inplace(x_ref, w_ref, o_ref, *, precision):
    """f32 output: output block is resident across the k (reduction) axis,
    accumulate straight into it (no extra scratch tile)."""
    @pl.when(pl.program_id(2) == 0)
    def _():
        o_ref[...] = jnp.zeros_like(o_ref)

    o_ref[...] += jnp.dot(
        x_ref[...], w_ref[...],
        preferred_element_type=jnp.float32, precision=precision,
    )


def _mm_kernel_tiled_scratch(x_ref, w_ref, o_ref, acc_ref, *, precision):
    """Non-f32 output: accumulate in an f32 VMEM scratch, cast on last k step."""
    @pl.when(pl.program_id(2) == 0)
    def _():
        acc_ref[...] = jnp.zeros_like(acc_ref)

    acc_ref[...] += jnp.dot(
        x_ref[...], w_ref[...],
        preferred_element_type=jnp.float32, precision=precision,
    )

    @pl.when(pl.program_id(2) == pl.num_programs(2) - 1)
    def _():
        o_ref[...] = acc_ref[...].astype(o_ref.dtype)


# ---------------------------------------------------------------------------
# Tile selection / VMEM budgeting
# ---------------------------------------------------------------------------
def _round_up(x: int, m: int) -> int:
    return ((x + m - 1) // m) * m


def _vmem_budget_bytes():
    """Returns (tile_budget, vmem_limit). Single headroom factor, with a hard
    per-TensorCore 64 MiB cap on v7x (get_tpu_info may report per-chip VMEM)."""
    phys = 128 << 20
    try:
        phys = int(pltpu.get_tpu_info().vmem_capacity_bytes)
    except Exception:  # not on TPU / query unsupported
        pass
    try:
        kind = jax.devices()[0].device_kind.lower()
        if "v7" in kind:
            phys = min(phys, 64 << 20)  # per-TensorCore VMEM on v7x
    except Exception:
        pass
    return int(phys * 0.80), int(phys * 0.90)


def _fit_dim(size: int, align: int, cap: int, max_pad_frac: float = 0.0):
    """Pick a tile <= cap for a dim of `size` (both multiples of `align`).
    Prefers exact divisors of `size` (no padding). Allows bounded padding to a
    multiple of `cap` only when the best divisor is poor and max_pad_frac > 0.
    Returns (tile, padded_size)."""
    cap = max(align, (cap // align) * align)
    if size <= cap:
        return size, size
    q = size // align
    best = align
    i = 1
    while i * i <= q:
        if q % i == 0:
            for d in (i, q // i):
                t = d * align
                if t <= cap:
                    best = max(best, t)
        i += 1
    if best * 2 >= cap or max_pad_frac <= 0.0:
        return best, size
    padded = _round_up(size, cap)
    if padded - size <= max_pad_frac * size:
        return cap, padded
    return best, size


# ---------------------------------------------------------------------------
# Wrapper
# ---------------------------------------------------------------------------
def matmul_pallas(x, w, *, compute_dtype=None, precision=None,
                  max_resident_w_bytes=None, interpret=False):
    """Computes x @ w (torch.matmul semantics over leading batch dims of x).

    compute_dtype=jnp.bfloat16 halves input DMA (MXU already runs bf16 passes
    under DEFAULT precision); precision=jax.lax.Precision.HIGHEST gives
    f32-exact results at ~3x MXU cost.
    """
    # TODO(synk): 1-D x and batched (3-D) weight broadcasting of torch.matmul
    # are out of scope; only leading batch dims on x are handled.
    lead_shape = x.shape[:-1]
    K_in, N = w.shape
    x2d = x.reshape(-1, K_in)
    M, K = x2d.shape
    out_dtype = jnp.result_type(x.dtype, w.dtype)

    if compute_dtype is not None:
        x2d = x2d.astype(compute_dtype)
        w = w.astype(compute_dtype)

    bx = jnp.dtype(x2d.dtype).itemsize
    bw = jnp.dtype(w.dtype).itemsize
    bo = jnp.dtype(out_dtype).itemsize

    budget, vmem_limit = _vmem_budget_bytes()

    # Alignment-only padding: M -> 8, K/N -> 128 (lane-dense output, aligned
    # MXU operands) — NOT tile-granularity padding.
    Mp, Kp, Np = _round_up(M, 8), _round_up(K, 128), _round_up(N, 128)

    if max_resident_w_bytes is None:
        max_resident_w_bytes = min(16 << 20, budget // 3)

    w_bytes = Kp * Np * bw
    use_resident_w = w_bytes <= max_resident_w_bytes

    if use_resident_w:
        # ---- Fast path: resident weight, 1-D grid over M tiles -------------
        per_row = 2 * Kp * bx + 2 * Np * bo   # double-buffered x row + out row
        tm_max = max(8, ((budget - w_bytes) // max(per_row, 1)) // 8 * 8)
        tm_cap = min(1024, tm_max)
        tm, Mp2 = _fit_dim(Mp, 8, tm_cap, max_pad_frac=0.125)
        # v7x has 2 TensorCores that only engage via parallel grid axes: keep
        # the parallel axis >= 2 steps when M allows it (negligible elsewhere).
        if Mp2 // tm == 1 and Mp >= 16:
            tm = _round_up((Mp + 1) // 2, 8)
            Mp2 = 2 * tm

        if (Mp2, Kp) != (M, K):
            x2d = jnp.pad(x2d, ((0, Mp2 - M), (0, Kp - K)))
        if (Kp, Np) != (K, N):
            w = jnp.pad(w, ((0, Kp - K), (0, Np - N)))

        grid = (Mp2 // tm,)
        kernel = functools.partial(_mm_kernel_resident_w, precision=precision)
        in_specs = [
            pl.BlockSpec((tm, Kp), lambda i: (i, 0)),
            pl.BlockSpec((Kp, Np), lambda i: (0, 0)),   # constant -> DMA'd once
        ]
        out_specs = pl.BlockSpec((tm, Np), lambda i: (i, 0))
        scratch = []
        dim_sem = ("parallel",)
        bytes_accessed = Mp2 * Kp * bx + Kp * Np * bw + Mp2 * Np * bo
    else:
        # ---- Tiled path: 3-D grid (M, N, K-reduction innermost) ------------
        acc_in_out = jnp.dtype(out_dtype) == jnp.dtype(jnp.float32)

        def fp(tm_, tn_, tk_):
            acc = 0 if acc_in_out else tm_ * tn_ * 4
            return (2 * (tm_ * tk_ * bx + tk_ * tn_ * bw)
                    + 2 * tm_ * tn_ * bo + acc)

        # Grow the output tile toward the VMEM budget (raises arithmetic
        # intensity ~ tm*tn/((tm+tn)*bytes)); tk only amortizes per-step cost
        # and dilutes per-k accumulate traffic (v5e single vst slot).
        ladder = ((2048, 2048, 1024), (2048, 2048, 512), (2048, 1024, 512),
                  (1024, 1024, 512), (1024, 512, 512), (512, 512, 512),
                  (512, 256, 512), (256, 256, 512), (256, 128, 512),
                  (128, 128, 512), (64, 128, 256), (32, 128, 256),
                  (16, 128, 128), (8, 128, 128))
        tm_cap, tn_cap, tk_cap = ladder[-1]
        for cm, cn, ck in ladder:
            em, en, ek = min(cm, Mp), min(cn, Np), min(ck, Kp)
            if fp(em, en, ek) <= budget:
                tm_cap, tn_cap, tk_cap = cm, cn, ck
                break

        tk, _ = _fit_dim(Kp, 128, min(tk_cap, Kp))   # exact divisor: no K pad
        tn, _ = _fit_dim(Np, 128, min(tn_cap, Np))   # exact divisor: lane-dense
        tm, Mp2 = _fit_dim(Mp, 8, min(tm_cap, Mp), max_pad_frac=0.125)

        if (Mp2, Kp) != (M, K):
            x2d = jnp.pad(x2d, ((0, Mp2 - M), (0, Kp - K)))
        if (Kp, Np) != (K, N):
            w = jnp.pad(w, ((0, Kp - K), (0, Np - N)))

        grid = (Mp2 // tm, Np // tn, Kp // tk)
        kernel = functools.partial(
            _mm_kernel_tiled_inplace if acc_in_out else _mm_kernel_tiled_scratch,
            precision=precision)
        in_specs = [
            pl.BlockSpec((tm, tk), lambda i, j, k: (i, k)),
            pl.BlockSpec((tk, tn), lambda i, j, k: (k, j)),
        ]
        out_specs = pl.BlockSpec((tm, tn), lambda i, j, k: (i, j))
        scratch = [] if acc_in_out else [pltpu.VMEM((tm, tn), jnp.float32)]
        dim_sem = ("parallel", "parallel", "arbitrary")
        bytes_accessed = ((Np // tn) * Mp2 * Kp * bx
                          + (Mp2 // tm) * Kp * Np * bw
                          + Mp2 * Np * bo)

    cost = pl.CostEstimate(
        flops=2 * M * N * K,
        transcendentals=0,
        bytes_accessed=int(bytes_accessed),
    )

    out2d = pl.pallas_call(
        kernel,
        out_shape=jax.ShapeDtypeStruct((Mp2, Np), out_dtype),
        grid_spec=pltpu.PrefetchScalarGridSpec(
            num_scalar_prefetch=0,
            grid=grid,
            in_specs=in_specs,
            out_specs=out_specs,
            scratch_shapes=scratch,
        ),
        compiler_params=pltpu.CompilerParams(
            dimension_semantics=dim_sem,
            vmem_limit_bytes=int(vmem_limit),
        ),
        cost_estimate=cost,
        interpret=interpret,
    )(x2d, w)

    if (Mp2, Np) != (M, N):
        out2d = out2d[:M, :N]
    return out2d.reshape(*lead_shape, N)


class MatmulModuleJax:
    """JAX/Pallas equivalent of the PyTorch MatmulModule (y = x @ W)."""

    def __init__(self, input_features: int, output_features: int, key):
        # torch.randn -> standard normal, float32; deterministic via PRNGKey.
        self.weight = jax.random.normal(
            key, (input_features, output_features), dtype=jnp.float32
        )

    def __call__(self, x):
        return matmul_pallas(x, self.weight)


if __name__ == "__main__":
    key = jax.random.PRNGKey(0)
    k_w, k_x, k_x2, k_w2, k_x3, k_w3 = jax.random.split(key, 6)

    # 1) Small shapes consistent with the module's forward (resident-W path).
    batch, input_features, output_features = 8, 32, 64
    module = MatmulModuleJax(input_features, output_features, k_w)
    x = jax.random.normal(k_x, (batch, input_features), dtype=jnp.float32)
    out = jax.block_until_ready(module(x))
    ref = x @ module.weight
    assert out.shape == (batch, output_features)
    assert jnp.allclose(out, ref, atol=1e-4, rtol=1e-4)

    # 2) Odd, non-aligned shapes, forcing the tiled 3-D-grid path: exercises
    #    alignment-only padding, divisor-fitted tiles and in-place f32 accumulate.
    M2, K2, N2 = 263, 200, 130
    x2 = jax.random.normal(k_x2, (M2, K2), dtype=jnp.float32)
    w2 = jax.random.normal(k_w2, (K2, N2), dtype=jnp.float32)
    out2 = jax.block_until_ready(matmul_pallas(x2, w2, max_resident_w_bytes=0))
    ref2 = x2 @ w2
    assert out2.shape == (M2, N2)
    assert jnp.allclose(out2, ref2, atol=1e-3, rtol=1e-3)

    # 3) bf16 operands (halved DMA bytes), forced tiled path -> exercises the
    #    f32 scratch-accumulator kernel (non-f32 output dtype).
    x3 = jax.random.normal(k_x3, (64, 256), dtype=jnp.bfloat16)
    w3 = jax.random.normal(k_w3, (256, 128), dtype=jnp.bfloat16)
    out3 = jax.block_until_ready(matmul_pallas(x3, w3, max_resident_w_bytes=0))
    ref3 = jnp.dot(x3, w3, preferred_element_type=jnp.float32).astype(jnp.bfloat16)
    assert out3.shape == (64, 128)
    assert jnp.allclose(out3.astype(jnp.float32), ref3.astype(jnp.float32),
                        atol=5e-2, rtol=5e-2)

    # 4) Leading batch dims on x (torch.matmul broadcasting over batch) and the
    #    >=2-parallel-block split for the resident-W path.
    x4 = jax.random.normal(k_x, (2, 8, input_features), dtype=jnp.float32)
    out4 = jax.block_until_ready(module(x4))
    assert out4.shape == (2, 8, output_features)
    assert jnp.allclose(out4, x4 @ module.weight, atol=1e-4, rtol=1e-4)

    print("KERNEL_OK")
</pallas_src>

<mosaic_0001>
module attributes {stable_mosaic.version = 11 : i64} {
  func.func @_mm_kernel_resident_w(%arg0: i32, %arg1: memref<8x128xf32, #tpu.memory_space<vmem>>, %arg2: memref<128x128xf32, #tpu.memory_space<vmem>>, %arg3: memref<8x128xf32, #tpu.memory_space<vmem>>) attributes {dimension_semantics = [#tpu.dimension_semantics<parallel>], iteration_bounds = array<i64: 1>, scalar_prefetch = 0 : i64, scratch_operands = 0 : i64, tpu.core_type = #tpu.core_type<tc>, window_params = [{transform_indices = @transform_0, window_bounds = array<i64: 8, 128>}, {pipeline_mode = #tpu.pipeline_mode<synchronous>, transform_indices = @transform_1, window_bounds = array<i64: 128, 128>}, {transform_indices = @transform_2, window_bounds = array<i64: 8, 128>}]} {
    %c0 = arith.constant 0 : index
    %c0_0 = arith.constant 0 : index
    %0 = vector.load %arg1[%c0, %c0_0] : memref<8x128xf32, #tpu.memory_space<vmem>>, vector<8x128xf32>
    %c0_1 = arith.constant 0 : index
    %c0_2 = arith.constant 0 : index
    %1 = vector.load %arg2[%c0_1, %c0_2] : memref<128x128xf32, #tpu.memory_space<vmem>>, vector<128x128xf32>
    %cst = arith.constant dense<0.000000e+00> : vector<8x128xf32>
    %2 = tpu.matmul %0, %1, %cst {dimension_numbers = #tpu.dot_dimension_numbers<[1], [0], [0], [1], [0, 0, 1, 1], [], []>} : vector<8x128xf32>, vector<128x128xf32>, vector<8x128xf32> -> vector<8x128xf32>
    %c0_3 = arith.constant 0 : index
    %c0_4 = arith.constant 0 : index
    %3 = vector.load %arg3[%c0_3, %c0_4] : memref<8x128xf32, #tpu.memory_space<vmem>>, vector<8x128xf32>
    tpu.vector_store %arg3[%c0_3, %c0_4], %2 {strides = array<i32>} : memref<8x128xf32, #tpu.memory_space<vmem>>, vector<8x128xf32>,
    return
  }
  func.func @transform_0(%arg0: i32) -> (i32, i32) {
    %c0_i32 = arith.constant 0 : i32
    %c0_i32_0 = arith.constant 0 : i32
    return %arg0, %c0_i32 : i32, i32
  }
  func.func @transform_1(%arg0: i32) -> (i32, i32) {
    %c0_i32 = arith.constant 0 : i32
    %c0_i32_0 = arith.constant 0 : i32
    %c0_i32_1 = arith.constant 0 : i32
    return %c0_i32, %c0_i32_0 : i32, i32
  }
  func.func @transform_2(%arg0: i32) -> (i32, i32) {
    %c0_i32 = arith.constant 0 : i32
    %c0_i32_0 = arith.constant 0 : i32
    return %arg0, %c0_i32 : i32, i32
  }
}

</mosaic_0001>

<bundles_post_ra>
// kernel: tpu_custom_call.1
= control target key start
LH: loop header
LB: loop body
LE: loop exit
PB: predicated region body
PF: predicated region fallthrough
CT: control target
= control target key end

     0   :  { %7 = vsyncpa [#allocation3], 0  ;;  %s298_s0 = inlined_call_operand.hbm [shape: f32[8,128], index: 0, kind: input, shape index: {}]   ;;  %s299_s1 = inlined_call_operand.hbm [shape: f32[128,128], index: 1, kind: input, shape index: {}]   ;;  %s300_s2 = inlined_call_operand.hbm [shape: f32[8,128], index: 2, kind: output, shape index: {}]  }
   0x1   :  { %8 = vsyncpa [#allocation6], 0 }
   0x2   :  { %9 = vsyncpa [#allocation4], 0  ;;  %s267_s9 = smov [#allocation2]   ;;  %s268_s11 = smov [#allocation5]  }
   0x3   :  { %s16_s10 = sshll.u32 %s267_s9, 4  ;;  %s25_s12 = sshll.u32 %s268_s11, 4  ;;  %s17_s10 = int_to_ptr.vmem [resolvable:$true] %s16_s10  ;;  %s26_s12 = int_to_ptr.vmem [resolvable:$true] %s25_s12 }
   0x4   :  { %s209_s13 = scalar_lea.vmem %s17_s10, 128  ;;  %p214_p1 = scmp.lt.s32.totalorder %s17_s10, %s17_s10 }
   0x5   :  { %p210_p0 = scmp.ne.s32.totalorder %s17_s10, %s209_s13  ;;  %p215_p2 = scmp.lt.s32.totalorder %s209_s13, %s209_s13 }
   0x7   :  { %p216_p3 = por %p215_p2, %p214_p1 }
   0x9   :  { %p217_p4 = pnand %p216_p3, %p210_p0 }
   0xb   :  { %220 = shalt.err (!%p217_p4)
}
   0xc   :  { %19 = dma.hbm_to_vmem [thread:$0]  %s298_s0, 128, %s17_s10, [#allocation3]  }
   0xd   :  { %s229_s16 = scalar_lea.vmem %s26_s12, 2048  ;;  %p234_p6 = scmp.lt.s32.totalorder %s26_s12, %s26_s12 }
   0xe   :  { %p230_p5 = scmp.ne.s32.totalorder %s26_s12, %s229_s16  ;;  %p235_p7 = scmp.lt.s32.totalorder %s229_s16, %s229_s16 }
  0x10   :  { %p236_p8 = por %p235_p7, %p234_p6 }
  0x12   :  { %p237_p9 = pnand %p236_p8, %p230_p5 }
  0x14   :  { %240 = shalt.err (!%p237_p9)
}
  0x15   :  { %s269_s17 = smov 128   ;;  %s270_s18 = smov 8  }
  0x16   :  { %31 = dma.hbm_to_vmem [thread:$0]  %s299_s1, 2048, %s26_s12, [#allocation6], %s269_s17, %s269_s17, %s270_s18  }
  0x17   :  { %261 = dma.done.wait [#allocation3], 128  }
  0x18   :  { %262 = vsyncadd [#allocation3], 4294967168 }
  0x19   :  { %263 = dma.done.wait [#allocation6], 2048  }
  0x1a   :  { %264 = vsyncadd [#allocation6], 4294965248  ;;  %v271_v0 = vmov 0.0   ;;  %vm272_vm0 = vmmov 0   ;;  %v54_v1 = vld [vmem:[#allocation5 + $0x78] sm:$0xff]  ;;  %v53_v2 = vld [vmem:[#allocation5 + $0x70] sm:$0xff] }
  0x1b   :  { %159 = vmatprep.subr.mxu0 %v271_v0  ;;  %191 = vmatprep.mubr.msk.f32.mxu0 %vm272_vm0, %v271_v0  ;;  %v52_v3 = vld [vmem:[#allocation5 + $0x68] sm:$0xff]  ;;  %v51_v4 = vld [vmem:[#allocation5 + $0x60] sm:$0xff]  ;;  %v50_v5 = vld [vmem:[#allocation5 + $0x58] sm:$0xff]  ;;  %s273_s0 = smov [#allocation7]  }
  0x1c   :  { %160 = vmatpush3.msra.mxu0 %v54_v1  ;;  %v49_v6 = vld [vmem:[#allocation5 + $0x50] sm:$0xff]  ;;  %v48_v7 = vld [vmem:[#allocation5 + $0x48] sm:$0xff]  ;;  %v47_v8 = vld [vmem:[#allocation5 + $0x40] sm:$0xff]  ;;  %s132_s1 = sshll.u32 %s273_s0, 4  ;;  %s133_s1 = int_to_ptr.vmem [resolvable:$true] %s132_s1 }
  0x1d   :  { %161 = vmatprep.subr.mxu0 %v271_v0  ;;  %v46_v9 = vld [vmem:[#allocation5 + $0x38] sm:$0xff]  ;;  %v45_v10 = vld [vmem:[#allocation5 + $0x30] sm:$0xff]  ;;  %v44_v11 = vld [vmem:[#allocation5 + $0x28] sm:$0xff]  ;;  %s241_s21 = scalar_lea.vmem %s133_s1, 128  ;;  %p246_p11 = scmp.lt.s32.totalorder %s133_s1, %s133_s1 }
  0x1e   :  { %162 = vmatpush3.msra.mxu0 %v53_v2  ;;  %v43_v12 = vld [vmem:[#allocation5 + $0x20] sm:$0xff]  ;;  %v42_v13 = vld [vmem:[#allocation5 + $0x18] sm:$0xff]  ;;  %v41_v14 = vld [vmem:[#allocation5 + $0x10] sm:$0xff]  ;;  %p242_p10 = scmp.ne.s32.totalorder %s133_s1, %s241_s21  ;;  %p247_p12 = scmp.lt.s32.totalorder %s241_s21, %s241_s21 }
  0x1f   :  { %163 = vmatprep.subr.mxu0 %v271_v0  ;;  %v40_v15 = vld [vmem:[#allocation5 + $0x8] sm:$0xff]  ;;  %v39_v16 = vld [vmem:[#allocation5] sm:$0xff]  ;;  %v38_v17 = vld [vmem:[#allocation2] sm:$0xff] }
  0x20   :  { %164 = vmatpush3.msra.mxu0 %v52_v3  ;;  %p248_p13 = por %p247_p12, %p246_p11 }
  0x21   :  { %165 = vmatprep.subr.mxu0 %v271_v0 }
  0x22   :  { %166 = vmatpush3.msra.mxu0 %v51_v4  ;;  %p249_p0 = pnand %p248_p13, %p242_p10 }
  0x23   :  { %167 = vmatprep.subr.mxu0 %v271_v0 }
  0x24   :  { %168 = vmatpush3.msra.mxu0 %v50_v5 }
  0x25   :  { %169 = vmatprep.subr.mxu0 %v271_v0 }
  0x26   :  { %170 = vmatpush3.msra.mxu0 %v49_v6 }
  0x27   :  { %171 = vmatprep.subr.mxu0 %v271_v0 }
  0x28   :  { %172 = vmatpush3.msra.mxu0 %v48_v7 }
  0x29   :  { %173 = vmatprep.subr.mxu0 %v271_v0 }
  0x2a   :  { %174 = vmatpush3.msra.mxu0 %v47_v8 }
  0x2b   :  { %175 = vmatprep.subr.mxu0 %v271_v0 }
  0x2c   :  { %176 = vmatpush3.msra.mxu0 %v46_v9 }
  0x2d   :  { %177 = vmatprep.subr.mxu0 %v271_v0 }
  0x2e   :  { %178 = vmatpush3.msra.mxu0 %v45_v10 }
  0x2f   :  { %179 = vmatprep.subr.mxu0 %v271_v0 }
  0x30   :  { %180 = vmatpush3.msra.mxu0 %v44_v11 }
  0x31   :  { %181 = vmatprep.subr.mxu0 %v271_v0 }
  0x32   :  { %182 = vmatpush3.msra.mxu0 %v43_v12 }
  0x33   :  { %183 = vmatprep.subr.mxu0 %v271_v0 }
  0x34   :  { %184 = vmatpush3.msra.mxu0 %v42_v13 }
  0x35   :  { %185 = vmatprep.subr.mxu0 %v271_v0 }
  0x36   :  { %186 = vmatpush3.msra.mxu0 %v41_v14 }
  0x37   :  { %187 = vmatprep.subr.mxu0 %v271_v0 }
  0x38   :  { %188 = vmatpush3.msra.mxu0 %v40_v15 }
  0x39   :  { %189 = vmatprep.subr.mxu0 %v271_v0 }
  0x3a   :  { %190 = vmatpush3.msra.mxu0 %v39_v16 }
  0x3b   :  { %192 = vmatmul.mubr.f32.vlgmr.msra.gmra.mxu0 %v38_v17 }
  0xfb   :  { %v121_v18 = vpop.f32.mrf.mxu0 }
  0xfc   :  { %125 = vst [vmem:[#allocation7] sm:$0xff] %v121_v18 }
  0xfd   :  { %v193_v19 = vpop.f32.mrf.mxu0 }
  0xfe   :  { %252 = shalt.err (!%p249_p0)
}
  0xff   :  { %135 = dma.vmem_to_hbm [thread:$0]  %s133_s1, 128, %s300_s2, [#allocation4]  }
 0x100   :  { %265 = dma.done.wait [#allocation4], 128  }
 0x101   :  { %266 = vsyncadd [#allocation4], 4294967168 }
 0x102   :  { %139 = vsyncpa [#allocation3], 1 }
 0x103   :  { %140 = vsyncpa [#allocation6], 1 }
 0x104   :  { %141 = vsyncpa [#allocation4], 1 }

</bundles_post_ra>
